<compile_context>
chip_gen: v6e
topology: v6e:2x2x1
jax: 0.10.0
libtpu: 0.0.40
codegen_flags: <defaults>
</compile_context>

<pallas_src>
import functools

import jax
import jax.numpy as jnp
from jax.experimental import pallas as pl
from jax.experimental.pallas import tpu as pltpu


def _round_up(n, m):
    return ((n + m - 1) // m) * m


def _prenet_kernel(x_ref, w1_ref, b1_ref, w2_ref, b2_ref, o_ref):
    # Cast the (VMEM-resident) x tile to the MXU operand dtype; the HBM read
    # stays at the caller's dtype, so this cast adds no memory traffic.
    x = x_ref[...].astype(w1_ref.dtype)
    # Linear 1 + ReLU: MXU matmul with f32 accumulation, f32 elementwise tail.
    h = jnp.dot(x, w1_ref[...], preferred_element_type=jnp.float32)
    h = jnp.maximum(h + b1_ref[...], 0.0)              # (tile,H) + (1,H)
    # Linear 2 + ReLU: only the MXU operand is cast; accumulation stays f32.
    o = jnp.dot(h.astype(w2_ref.dtype), w2_ref[...],
                preferred_element_type=jnp.float32)
    o = jnp.maximum(o + b2_ref[...], 0.0)
    o_ref[...] = o.astype(o_ref.dtype)


@functools.partial(
    jax.jit, static_argnames=("row_tile", "matmul_dtype", "out_dtype"))
def decoder_prenet(x, w1, b1, w2, b2, *, row_tile=1024,
                   matmul_dtype=jnp.bfloat16, out_dtype=None):
    """Eval-mode DecoderPreNet: ReLU(ReLU(x @ W1 + b1) @ W2 + b2).

    x:  [B, T, mel_dims]
    w1: [mel_dims, hidden_dims]   (transposed vs. torch nn.Linear)
    b1: [hidden_dims]
    w2: [hidden_dims, hidden_dims]
    b2: [hidden_dims]
    matmul_dtype: dtype of the MXU operands (bf16 default; jnp.float32 for an
      exact path; None -> x.dtype).  Accumulation / bias / ReLU stay float32.
    out_dtype: output dtype (default x.dtype); bf16 halves store bytes.
    """
    B, T, mel_dims = x.shape
    hidden_dims = w1.shape[1]
    N = B * T

    out_dtype = x.dtype if out_dtype is None else out_dtype
    op_dtype = x.dtype if matmul_dtype is None else jnp.dtype(matmul_dtype)

    # x: no pad, no cast -> single HBM read of the activation, nothing more.
    x2d = x.reshape(N, mel_dims)

    # Tiny params: cast once outside the hot loop; biases stay f32 as (1, H)
    # rows for sublane broadcast inside the kernel.
    w1c = w1.astype(op_dtype)
    w2c = w2.astype(op_dtype)
    b1r = b1.reshape(1, hidden_dims).astype(jnp.float32)
    b2r = b2.reshape(1, hidden_dims).astype(jnp.float32)

    # Row tile: large tiles amortize the ~0.35us/grid-step pipeline overhead;
    # cap at ~N/2 (rounded to the 8-sublane granule) so the parallel row axis
    # has >=2 steps whenever N permits -> v7x's two TensorCores both get work.
    tile = min(row_tile, max(8, _round_up(pl.cdiv(N, 2), 8)))
    grid = (pl.cdiv(N, tile),)

    # VMEM: at tile=1024, hid=256 f32 the out block is ~1 MiB (x2 buffers),
    # x block ~0.3 MiB (x2), weights < 0.5 MiB -> far below the 32 MiB default
    # scoped VMEM on every generation.  (If hidden_dims ever grows >= 1024 on
    # v7x, consider pl.Buffered(1) on the constant-index weight specs and/or
    # vmem_limit_bytes.)
    out2d = pl.pallas_call(
        _prenet_kernel,
        out_shape=jax.ShapeDtypeStruct((N, hidden_dims), out_dtype),
        grid_spec=pltpu.PrefetchScalarGridSpec(
            num_scalar_prefetch=0,
            grid=grid,
            in_specs=[
                # Tile rows of x; weights/biases have constant index_maps so
                # they are DMA'd once and stay resident in VMEM.
                pl.BlockSpec((tile, mel_dims), lambda i: (i, 0)),
                pl.BlockSpec((mel_dims, hidden_dims), lambda i: (0, 0)),
                pl.BlockSpec((1, hidden_dims), lambda i: (0, 0)),
                pl.BlockSpec((hidden_dims, hidden_dims), lambda i: (0, 0)),
                pl.BlockSpec((1, hidden_dims), lambda i: (0, 0)),
            ],
            out_specs=pl.BlockSpec((tile, hidden_dims), lambda i: (i, 0)),
        ),
        compiler_params=pltpu.CompilerParams(
            dimension_semantics=("parallel",)),
    )(x2d, w1c, b1r, w2c, b2r)

    # True-N, true-hidden output: pure reshape, no slice copy.
    return out2d.reshape(B, T, hidden_dims)


def init_params(key, mel_dims, hidden_dims, dtype=jnp.float32):
    """Deterministic synthetic params, PyTorch-Linear-style uniform init.

    Stored transposed relative to torch ([in, out] instead of [out, in])."""
    k1, k2, k3, k4 = jax.random.split(key, 4)
    bound1 = 1.0 / (mel_dims ** 0.5)
    bound2 = 1.0 / (hidden_dims ** 0.5)
    w1 = jax.random.uniform(k1, (mel_dims, hidden_dims), dtype, -bound1, bound1)
    b1 = jax.random.uniform(k2, (hidden_dims,), dtype, -bound1, bound1)
    w2 = jax.random.uniform(k3, (hidden_dims, hidden_dims), dtype, -bound2, bound2)
    b2 = jax.random.uniform(k4, (hidden_dims,), dtype, -bound2, bound2)
    return w1, b1, w2, b2


def _reference(x, w1, b1, w2, b2):
    h = jnp.maximum(jnp.dot(x, w1) + b1, 0.0)
    return jnp.maximum(jnp.dot(h, w2) + b2, 0.0)


if __name__ == "__main__":
    key = jax.random.PRNGKey(0)
    kx, kp, kx2, kp2 = jax.random.split(key, 4)

    # Small shapes consistent with the module.
    B, T, mel_dims, hidden_dims = 2, 8, 32, 32
    x = jax.random.normal(kx, (B, T, mel_dims), jnp.float32)
    w1, b1, w2, b2 = init_params(kp, mel_dims, hidden_dims)
    ref = _reference(x, w1, b1, w2, b2)

    # Exact path: f32 MXU operands.
    out = jax.block_until_ready(
        decoder_prenet(x, w1, b1, w2, b2, matmul_dtype=jnp.float32))
    assert out.shape == (B, T, hidden_dims)
    assert jnp.allclose(out, ref, atol=1e-5, rtol=1e-5)

    # Default path: bf16 MXU operands, f32 accumulation (looser tolerance).
    out_bf = jax.block_until_ready(decoder_prenet(x, w1, b1, w2, b2))
    assert jnp.allclose(out_bf, ref, atol=3e-2, rtol=3e-2)

    # Ragged case: N=15 rows (not a tile multiple), mel=80 (not 128-aligned).
    B2, T2, mel2, hid2 = 3, 5, 80, 128
    x2 = jax.random.normal(kx2, (B2, T2, mel2), jnp.float32)
    p2 = init_params(kp2, mel2, hid2)
    ref2 = _reference(x2, *p2)
    out2 = jax.block_until_ready(
        decoder_prenet(x2, *p2, matmul_dtype=jnp.float32))
    assert out2.shape == (B2, T2, hid2)
    assert jnp.allclose(out2, ref2, atol=1e-5, rtol=1e-5)

    # bf16 output dtype (mem-bound store optimization).
    out2_bf = jax.block_until_ready(
        decoder_prenet(x2, *p2, out_dtype=jnp.bfloat16))
    assert out2_bf.dtype == jnp.bfloat16
    assert jnp.allclose(out2_bf.astype(jnp.float32), ref2, atol=5e-2, rtol=5e-2)

    print("KERNEL_OK")
</pallas_src>

<mosaic_0001>
module attributes {stable_mosaic.version = 11 : i64} {
  func.func @_prenet_kernel(%arg0: i32, %arg1: memref<8x32xf32, #tpu.memory_space<vmem>>, %arg2: memref<32x32xf32, #tpu.memory_space<vmem>>, %arg3: memref<1x32xf32, #tpu.memory_space<vmem>>, %arg4: memref<32x32xf32, #tpu.memory_space<vmem>>, %arg5: memref<1x32xf32, #tpu.memory_space<vmem>>, %arg6: memref<8x32xf32, #tpu.memory_space<vmem>>) attributes {dimension_semantics = [#tpu.dimension_semantics<parallel>], iteration_bounds = array<i64: 2>, scalar_prefetch = 0 : i64, scratch_operands = 0 : i64, tpu.core_type = #tpu.core_type<tc>, window_params = [{transform_indices = @transform_0, window_bounds = array<i64: 8, 32>}, {pipeline_mode = #tpu.pipeline_mode<synchronous>, transform_indices = @transform_1, window_bounds = array<i64: 32, 32>}, {pipeline_mode = #tpu.pipeline_mode<synchronous>, transform_indices = @transform_2, window_bounds = array<i64: 1, 32>}, {pipeline_mode = #tpu.pipeline_mode<synchronous>, transform_indices = @transform_3, window_bounds = array<i64: 32, 32>}, {pipeline_mode = #tpu.pipeline_mode<synchronous>, transform_indices = @transform_4, window_bounds = array<i64: 1, 32>}, {transform_indices = @transform_5, window_bounds = array<i64: 8, 32>}]} {
    %c0 = arith.constant 0 : index
    %c0_0 = arith.constant 0 : index
    %0 = vector.load %arg1[%c0, %c0_0] : memref<8x32xf32, #tpu.memory_space<vmem>>, vector<8x32xf32>
    %c0_1 = arith.constant 0 : index
    %c0_2 = arith.constant 0 : index
    %1 = vector.load %arg2[%c0_1, %c0_2] : memref<32x32xf32, #tpu.memory_space<vmem>>, vector<32x32xf32>
    %cst = arith.constant dense<0.000000e+00> : vector<8x32xf32>
    %2 = tpu.matmul %0, %1, %cst {dimension_numbers = #tpu.dot_dimension_numbers<[1], [0], [0], [1], [0, 0, 1, 1], [], []>} : vector<8x32xf32>, vector<32x32xf32>, vector<8x32xf32> -> vector<8x32xf32>
    %c0_3 = arith.constant 0 : index
    %c0_4 = arith.constant 0 : index
    %3 = vector.load %arg3[%c0_3, %c0_4] : memref<1x32xf32, #tpu.memory_space<vmem>>, vector<1x32xf32>
    %4 = vector.broadcast %3 : vector<1x32xf32> to vector<8x32xf32>
    %5 = arith.addf %2, %4 : vector<8x32xf32>
    %cst_5 = arith.constant 0.000000e+00 : f32
    %6 = vector.broadcast %cst_5 : f32 to vector<8x32xf32>
    %7 = arith.maximumf %5, %6 : vector<8x32xf32>
    %c0_6 = arith.constant 0 : index
    %c0_7 = arith.constant 0 : index
    %8 = vector.load %arg4[%c0_6, %c0_7] : memref<32x32xf32, #tpu.memory_space<vmem>>, vector<32x32xf32>
    %cst_8 = arith.constant dense<0.000000e+00> : vector<8x32xf32>
    %9 = tpu.matmul %7, %8, %cst_8 {dimension_numbers = #tpu.dot_dimension_numbers<[1], [0], [0], [1], [0, 0, 1, 1], [], []>} : vector<8x32xf32>, vector<32x32xf32>, vector<8x32xf32> -> vector<8x32xf32>
    %c0_9 = arith.constant 0 : index
    %c0_10 = arith.constant 0 : index
    %10 = vector.load %arg5[%c0_9, %c0_10] : memref<1x32xf32, #tpu.memory_space<vmem>>, vector<1x32xf32>
    %11 = vector.broadcast %10 : vector<1x32xf32> to vector<8x32xf32>
    %12 = arith.addf %9, %11 : vector<8x32xf32>
    %cst_11 = arith.constant 0.000000e+00 : f32
    %13 = vector.broadcast %cst_11 : f32 to vector<8x32xf32>
    %14 = arith.maximumf %12, %13 : vector<8x32xf32>
    %c0_12 = arith.constant 0 : index
    %c0_13 = arith.constant 0 : index
    %15 = vector.load %arg6[%c0_12, %c0_13] : memref<8x32xf32, #tpu.memory_space<vmem>>, vector<8x32xf32>
    tpu.vector_store %arg6[%c0_12, %c0_13], %14 {strides = array<i32>} : memref<8x32xf32, #tpu.memory_space<vmem>>, vector<8x32xf32>,
    return
  }
  func.func @transform_0(%arg0: i32) -> (i32, i32) {
    %c0_i32 = arith.constant 0 : i32
    %c0_i32_0 = arith.constant 0 : i32
    return %arg0, %c0_i32 : i32, i32
  }
  func.func @transform_1(%arg0: i32) -> (i32, i32) {
    %c0_i32 = arith.constant 0 : i32
    %c0_i32_0 = arith.constant 0 : i32
    %c0_i32_1 = arith.constant 0 : i32
    return %c0_i32, %c0_i32_0 : i32, i32
  }
  func.func @transform_2(%arg0: i32) -> (i32, i32) {
    %c0_i32 = arith.constant 0 : i32
    %c0_i32_0 = arith.constant 0 : i32
    %c0_i32_1 = arith.constant 0 : i32
    return %c0_i32, %c0_i32_0 : i32, i32
  }
  func.func @transform_3(%arg0: i32) -> (i32, i32) {
    %c0_i32 = arith.constant 0 : i32
    %c0_i32_0 = arith.constant 0 : i32
    %c0_i32_1 = arith.constant 0 : i32
    return %c0_i32, %c0_i32_0 : i32, i32
  }
  func.func @transform_4(%arg0: i32) -> (i32, i32) {
    %c0_i32 = arith.constant 0 : i32
    %c0_i32_0 = arith.constant 0 : i32
    %c0_i32_1 = arith.constant 0 : i32
    return %c0_i32, %c0_i32_0 : i32, i32
  }
  func.func @transform_5(%arg0: i32) -> (i32, i32) {
    %c0_i32 = arith.constant 0 : i32
    %c0_i32_0 = arith.constant 0 : i32
    return %arg0, %c0_i32 : i32, i32
  }
}

</mosaic_0001>

<bundles_post_ra>
// kernel: decoder_prenet.1
= control target key start
LH: loop header
LB: loop body
LE: loop exit
PB: predicated region body
PF: predicated region fallthrough
CT: control target
= control target key end

     0   :  { %10 = vsyncpa [#allocation3], 0  ;;  %s1034_s0 = inlined_call_operand.hbm [shape: f32[16,32], index: 0, kind: input, shape index: {}]   ;;  %s1035_s1 = inlined_call_operand.hbm [shape: f32[32,32], index: 1, kind: input, shape index: {}]   ;;  %s1036_s2 = inlined_call_operand.vmem [shape: f32[1,32], index: 2, kind: input, shape index: {}]   ;;  %s1037_s3 = inlined_call_operand.hbm [shape: f32[32,32], index: 3, kind: input, shape index: {}]   ;;  %s1038_s4 = inlined_call_operand.vmem [shape: f32[1,32], index: 4, kind: input, shape index: {}]   ;;  %s1039_s5 = inlined_call_operand.hbm [shape: f32[16,32], index: 5, kind: output, shape index: {}]  }
   0x1   :  { %12 = vsyncpa [#allocation3 + $0x1], 0 }
   0x2   :  { %13 = vsyncpa [#allocation6], 0 }
   0x3   :  { %14 = vsyncpa [#allocation4], 0 }
   0x4   :  { %16 = vsyncpa [#allocation4 + $0x1], 0  ;;  %s856_s18 = smov 0   ;;  %s858_s19 = smov 0  }
   0x5   :  { %s860_s20 = smov 0   ;;  %s862_s21 = smov 0  }
   0x6 LB: > { %s877_s22 = sadd.s32 4294967295, %s816_s21   ;;  %s545_s23 = sadd.s32 4294967294, %s816_s21   ;;  %s816_s21 = sphi %s862_s21, %s1061_s21   ;;  %s812_s20 = sphi %s860_s20, %s1060_s20   ;;  %s808_s19 = sphi %s858_s19, %s1059_s19   ;;  %s804_s18 = sphi %s856_s18, %s1058_s18  }
   0x7   : > { %p42_p0 = scmp.ne.s32.totalorder %s808_s19, %s804_s18  ;;  %p1040_p1 = scmp.eq.s32.totalorder %s877_s22, 0 }
   0x8   : > { %p156_p3 = scmp.eq.s32.totalorder %s545_s23, 1  ;;  %p546_p5 = scmp.ge.s32.totalorder %s816_s21, 1 }
   0x9   : > { %p886_p4 = por %p1040_p1, %p42_p0  ;;  %p163_p7 = scmp.lt.s32.totalorder %s816_s21, 3 }
   0xa   : > { %p891_p6 = por %p156_p3, %p42_p0  ;;  %s818_s27 = smov [#allocation5]  }
   0xb   : > { %s1044_s24 = scalar_select %p886_p4, 1, 0 }
   0xc   : > { %s1045_s25 = scalar_select %p891_p6, 1, 0 }
   0xd   : > { %p896_p8 = pnand %p546_p5, %p163_p7  ;;  %s175_s28 = sshll.u32 %s818_s27, 4  ;;  %s176_s28 = int_to_ptr.vmem [resolvable:$true] %s175_s28 }
   0xe   : > { %s819_s30 = smov [#allocation7]   ;;  %s679_s7 = scalar_lea.vmem %s176_s28, 512 }
   0xf   : > { %s1046_s26 = scalar_select %p896_p8, 1, 0 }
  0x10   : > { %p609_p9 = pneg %p896_p8  ;;  %s191_s6 = sshll.u32 %s819_s30, 4  ;;  %s192_s6 = int_to_ptr.vmem [resolvable:$true] %s191_s6 }
  0x11   : > { %p680_p13 = scmp.ne.s32.totalorder %s176_s28, %s679_s7  ;;  %p687_p5 = scmp.lt.s32.totalorder %s176_s28, %s176_s28 }
  0x12   : > { %p905_p11 = pnand %p609_p9, %p1040_p1  ;;  %p688_p7 = scmp.lt.s32.totalorder %s679_s7, %s679_s7 }
  0x14   : > { %p670_p12 = pneg %p905_p11  ;;  %p689_p10 = por %p688_p7, %p687_p5 }
  0x16   : > { %p682_p0 = pnand %p680_p13, %p670_p12 }
  0x18   : > { %p683_p3 = pneg %p682_p0 }
  0x1a   : > { %p690_p9 = pnand %p689_p10, %p683_p3 }
  0x1c   : > { %693 = shalt.err (!%p690_p9)
}
  0x1d   : > { %s820_s8 = smov 128   ;;  %s821_s9 = smov 8  }
  0x1e   : > { %612 = dma.hbm_to_vmem [thread:$0]  (!%p905_p11), %s1035_s1, 512, %s176_s28, [#allocation6], %s820_s8, %s820_s8, %s821_s9  }
  0x1f   : > { %s705_s12 = scalar_lea.vmem %s192_s6, 512  ;;  %p713_p2 = scmp.lt.s32.totalorder %s192_s6, %s192_s6 }
  0x20   : > { %p706_p1 = scmp.ne.s32.totalorder %s192_s6, %s705_s12  ;;  %p714_p6 = scmp.lt.s32.totalorder %s705_s12, %s705_s12 }
  0x22   : > { %p708_p13 = pnand %p706_p1, %p670_p12  ;;  %p715_p5 = por %p714_p6, %p713_p2 }
  0x24   : > { %p709_p0 = pneg %p708_p13 }
  0x26   : > { %p716_p10 = pnand %p715_p5, %p709_p0 }
  0x28   : > { %719 = shalt.err (!%p716_p10)
}
  0x29   : > { %615 = dma.hbm_to_vmem [thread:$0]  (!%p905_p11), %s1037_s3, 512, %s192_s6, [#allocation6], %s820_s8, %s820_s8, %s821_s9  }
  0x2a   : > { %s928_s15 = sadd.s32 1, %s816_s21   ;;  %s29_s16 = sadd.s32 1, %s812_s20 }
  0x2b   : > { %s26_s17 = ssub.s32 %s816_s21, %s928_s15  ;;  %p36_p1 = scmp.ne.s32.totalorder %s812_s20, %s808_s19 }
  0x2c   : > { %p27_p2 = scmp.eq.s32.totalorder %s26_s17, 0  ;;  %p37_p6 = scmp.eq.s32.totalorder %s816_s21, 0 }
  0x2d   : > { %p1048_p12 = scmp.eq.s32.totalorder %s877_s22, 1  ;;  %p626_p7 = scmp.lt.s32.totalorder %s816_s21, 2 }
  0x2e   : > { %s944_s27 = scalar_select %p27_p2, %s812_s20, %s29_s16  }
  0x2f   : > { %p938_p3 = por %p1048_p12, %p36_p1  ;;  %p38_p9 = por %p37_p6, %p36_p1 }
  0x30   : > { %s208_s28 = sand.u32 1, %s812_s20   ;;  %s551_s30 = sshll.u32 %s816_s21, 7 }
  0x31   : > { %s1049_s23 = scalar_select %p938_p3, 1, 0 }
  0x32   : > { %s550_s29 = sshll.u32 %s208_s28, 3  ;;  %s951_s8 = scalar_lea.hbm %s1034_s0, %s551_s30 }
  0x33   : > { %s212_s9 = scalar_lea.vmem [#allocation2], %s550_s29  ;;  %p953_p11 = pnand %p626_p7, %p38_p9 }
  0x34   : > { %s219_s10 = sshll.u32 %s212_s9, 4  ;;  %s209_s12 = scalar_lea.sflag [#allocation3], %s208_s28  ;;  %s220_s10 = int_to_ptr.vmem [resolvable:$true] %s219_s10 }
  0x35   : > { %s720_s13 = scalar_lea.hbm %s951_s8, 128  ;;  %p722_p0 = pneg %p953_p11 }
  0x36   : > { %p721_p13 = scmp.ne.s32.totalorder %s951_s8, %s720_s13  ;;  %s725_s17 = scalar_lea.hbm %s1034_s0, 256 }
  0x37   : > { %p726_p1 = scmp.lt.s32.totalorder %s951_s8, %s1034_s0  ;;  %p727_p2 = scmp.lt.s32.totalorder %s725_s17, %s720_s13 }
  0x38   : > { %p723_p5 = pnand %p722_p0, %p721_p13 }
  0x39   : > { %p728_p6 = por %p727_p2, %p726_p1 }
  0x3a   : > { %p724_p10 = pneg %p723_p5 }
  0x3c   : > { %p729_p12 = pnand %p728_p6, %p724_p10 }
  0x3e   : > { %732 = shalt.err (!%p729_p12)
}
  0x3f   : > { %s733_s6 = scalar_lea.vmem %s220_s10, 128  ;;  %s822_s28 = smov [#allocation2]  }
  0x40   : > { %p734_p7 = scmp.ne.s32.totalorder %s220_s10, %s733_s6  ;;  %s738_s7 = sshll.u32 %s822_s28, 4  ;;  %s739_s7 = int_to_ptr.vmem [resolvable:$false] %s738_s7 }
  0x41   : > { %s740_s9 = scalar_lea.vmem %s739_s7, 256  ;;  %p741_p13 = scmp.lt.s32.totalorder %s220_s10, %s739_s7 }
  0x42   : > { %p736_p9 = pnand %p734_p7, %p722_p0  ;;  %p742_p5 = scmp.lt.s32.totalorder %s740_s9, %s733_s6 }
  0x44   : > { %p737_p3 = pneg %p736_p9  ;;  %p743_p4 = por %p742_p5, %p741_p13 }
  0x46   : > { %p744_p8 = pnand %p743_p4, %p737_p3 }
  0x48   : > { %747 = shalt.err (!%p744_p8)
}
  0x49   : > { %619 = dma.hbm_to_vmem [thread:$0]  (!%p953_p11), %s951_s8, 128, %s220_s10, %s209_s12  }
  0x4a   : > { %p1051_p10 = scmp.ne.s32.totalorder %s1046_s26, 0 }
  0x4b   : > { %s974_s13 = sand.u32 (!%p1051_p10), 1, %s808_s19   ;;  %p1052_p4 = scmp.ne.s32.totalorder (!%p1051_p10), %s1044_s24, 0 }
  0x4c   : > { %228 = sbr.rel (%p1051_p10) target bundleno = 502 (0x1f6), region = 40  ;;  %s553_s14 = sshll.u32 (!%p1051_p10), %s974_s13, 3 }
  0x4d   : > { %s231_s16 = scalar_lea.sflag (!%p1051_p10), [#allocation3], %s974_s13  ;;  %s234_s17 = scalar_lea.vmem (!%p1051_p10), [#allocation2], %s553_s14 }
  0x51   : > { %791 = dma.done.wait (%p1052_p4), %s231_s16, 128  }
  0x52   : > { %793 = vsyncadd (%p1052_p4), %s231_s16, 4294967168  ;;  %p1053_p8 = scmp.eq.s32.totalorder %s877_s22, 0 }
  0x54   : > { %795 = dma.done.wait (%p1053_p8), [#allocation6], 1024   ;;  %p1054_p3 = pmov %p1053_p8 }
  0x55   : > { %v823_v0 = vmov 0.0   ;;  %vm824_vm0 = vmmov 0   ;;  %v273_v1 = vld [vmem:[#allocation5 + $0x18] sm:$0xff]  ;;  %v272_v2 = vld [vmem:[#allocation5 + $0x10] sm:$0xff]  ;;  %v271_v4 = vld [vmem:[#allocation5 + $0x8] sm:$0xff]  ;;  %vm281_vm1 = vcmask 261120  }
  0x56   : > { %797 = vsyncadd (%p1054_p3), [#allocation6], 4294966272  ;;  %575 = vmatprep.subr.mxu0 %v823_v0  ;;  %583 = vmatprep.mubr.msk.f32.mxu0 %vm824_vm0, %v823_v0  ;;  %v359_v3 = vld [vmem:[#allocation7 + $0x18] sm:$0xff]  ;;  %v270_v5 = vld [vmem:[#allocation5] sm:$0xff]  ;;  %s562_s11 = sshll.u32 %s877_s22, 7  ;;  %s268_s12 = scalar_lea.vmem [#allocation8], %s553_s14 }
  0x57   : > { %586 = vmatprep.subr.mxu1 %v823_v0  ;;  %594 = vmatprep.mubr.msk.f32.mxu1 %vm824_vm0, %v823_v0  ;;  %v269_v6 = vld [vmem:[%s234_s17] sm:$0xff]  ;;  %v357_v8 = vld [vmem:[#allocation7 + $0x8] sm:$0xff]  ;;  %v356_v9 = vld [vmem:[#allocation7] sm:$0xff]  ;;  %s456_s30 = sshll.u32 %s268_s12, 4  ;;  %s454_s28 = scalar_lea.hbm %s1039_s5, %s562_s11  ;;  %s457_s30 = int_to_ptr.vmem [resolvable:$true] %s456_s30 }
  0x58   : > { %576 = vmatpush3.msra.mxu0 %v273_v1  ;;  %587 = vmatpush3.msra.mxu1 %v359_v3  ;;  %v358_v7 = vld [vmem:[#allocation7 + $0x10] sm:$0xff]  ;;  %s443_s7 = scalar_lea.sflag [#allocation4], %s974_s13  ;;  %s748_s9 = scalar_lea.vmem %s457_s30, 128 }
  0x59   : > { %577 = vmatprep.subr.mxu0 %v823_v0  ;;  %588 = vmatprep.subr.mxu1 %v823_v0  ;;  %v557_v10 = vld [vmem:[%s1036_s2] ss:$0 sm:$0xff]  ;;  %p749_p11 = scmp.ne.s32.totalorder %s457_s30, %s748_s9  ;;  %p1055_p0 = scmp.ne.s32.totalorder %s1049_s23, 0 }
  0x5a   : > { %578 = vmatpush3.msra.mxu0 %v272_v2  ;;  %589 = vmatpush3.msra.mxu1 %v358_v7  ;;  %v559_v15 = vld [vmem:[%s1038_s4] ss:$0 sm:$0xff]  ;;  %s825_s22 = smov [#allocation8]  }
  0x5b   : > { %579 = vmatprep.subr.mxu0 %v823_v0  ;;  %590 = vmatprep.subr.mxu1 %v823_v0  ;;  %p750_p1 = pnand %p749_p11, %p1055_p0  ;;  %s752_s16 = sshll.u32 %s825_s22, 4  ;;  %s753_s16 = int_to_ptr.vmem [resolvable:$false] %s752_s16 }
  0x5c   : > { %580 = vmatpush3.msra.mxu0 %v271_v4  ;;  %591 = vmatpush3.msra.mxu1 %v357_v8  ;;  %s754_s14 = scalar_lea.vmem %s753_s16, 256  ;;  %p755_p6 = scmp.lt.s32.totalorder %s457_s30, %s753_s16 }
  0x5d   : > { %581 = vmatprep.subr.mxu0 %v823_v0  ;;  %592 = vmatprep.subr.mxu1 %v823_v0  ;;  %p751_p2 = pneg %p750_p1  ;;  %p756_p12 = scmp.lt.s32.totalorder %s754_s14, %s748_s9 }
  0x5e   : > { %582 = vmatpush3.msra.mxu0 %v270_v5  ;;  %593 = vmatpush3.msra.mxu1 %v356_v9 }
  0x5f   : > { %584 = vmatmul.mubr.msk.f32.vlgmr.msra.gmra.mxu0 %vm281_vm1, %v269_v6  ;;  %p757_p7 = por %p756_p12, %p755_p6 }
  0x61   : > { %p758_p9 = pnand %p757_p7, %p751_p2 }
 0x11f   : > { %v351_v11 = vpop.f32.mrf.mxu0 }
 0x120   : > { %v352_v12 = vadd.f32 %v557_v10, %v351_v11 }
 0x121   : > { %v585_v13 = vpop.f32.mrf.mxu0 }
 0x122   : > { %v355_v14 = vmax.f32 %v352_v12, 0.0 }
 0x124   : > { %595 = vmatmul.mubr.msk.f32.vlgmr.msra.gmra.mxu1 %vm281_vm1, %v355_v14 }
 0x1e4   : > { %v436_v16 = vpop.f32.mrf.mxu1 }
 0x1e5   : > { %v437_v17 = vadd.f32 %v559_v15, %v436_v16 }
 0x1e6   : > { %v596_v18 = vpop.f32.mrf.mxu1 }
 0x1e7   : > { %v440_v19 = vmax.f32 %v437_v17, 0.0 }
 0x1e9   : > { %441 = vst.msk [vmem:[%s268_s12] sm:$0xff] %vm281_vm1, %v440_v19 }
 0x1ea   : > { %761 = shalt.err (!%p758_p9)
}
 0x1eb   : > { %s762_s17 = scalar_lea.hbm %s454_s28, 128  ;;  %s766_s26 = scalar_lea.hbm %s1039_s5, 256 }
 0x1ec   : > { %p763_p13 = scmp.ne.s32.totalorder %s454_s28, %s762_s17  ;;  %p767_p4 = scmp.lt.s32.totalorder %s454_s28, %s1039_s5 }
 0x1ed   : > { %p768_p8 = scmp.lt.s32.totalorder %s766_s26, %s762_s17 }
 0x1ee   : > { %p764_p5 = pnand %p763_p13, %p1055_p0 }
 0x1ef   : > { %p769_p3 = por %p768_p8, %p767_p4 }
 0x1f0   : > { %p765_p10 = pneg %p764_p5 }
 0x1f2   : > { %p770_p11 = pnand %p769_p3, %p765_p10 }
 0x1f4   : > { %773 = shalt.err (!%p770_p11)
}
 0x1f5   : > { %607 = dma.vmem_to_hbm [thread:$0]  (%p1055_p0), %s457_s30, 128, %s454_s28, %s443_s7  }
 0x1f6 PF: > { %s468_s11 = sand.u32 1, %s804_s18   ;;  %p1056_p1 = scmp.ne.s32.totalorder %s1045_s25, 0 }
 0x1f7   : > { %p1057_p2 = scmp.ge.s32.totalorder %s816_s21, 2  ;;  %s469_s12 = scalar_lea.sflag [#allocation4], %s468_s11 }
 0x1f9   : > { %p621_p6 = pnand %p1057_p2, %p1056_p1 }
 0x1fb   : > { %p622_p12 = pneg %p621_p6 }
 0x1fd   : > { %799 = dma.done.wait (%p622_p12), %s469_s12, 128  }
 0x1fe   : > { %801 = vsyncadd (%p622_p12), %s469_s12, 4294967168  ;;  %p19_p7 = scmp.ge.s32.totalorder %s928_s15, 4   ;;  %s1058_s18 = smov %s808_s19 }
 0x1ff   : > { %s1059_s19 = smov %s812_s20  ;;  %s1060_s20 = smov %s944_s27 }
 0x200   : > { %s1061_s21 = smov %s928_s15  ;;  %21 = sbr.rel (!%p19_p7) target bundleno = 6 (0x6), region = 93 }
 0x205   :  { %474 = vsyncpa [#allocation3], 1 }
 0x206   :  { %476 = vsyncpa [#allocation3 + $0x1], 1 }
 0x207   :  { %477 = vsyncpa [#allocation6], 1 }
 0x208   :  { %478 = vsyncpa [#allocation4], 1 }
 0x209   :  { %480 = vsyncpa [#allocation4 + $0x1], 1 }

</bundles_post_ra>
